<compile_context>
chip_gen: v7x
topology: tpu7x:2x2x1
jax: 0.10.0
libtpu: 0.0.40
codegen_flags: <defaults>
</compile_context>

<pallas_src>
import jax
import jax.numpy as jnp
from jax.experimental import pallas as pl
from jax.experimental.pallas import tpu as pltpu


def logreg_kernel(x_ref, w_ref, b_ref, o_ref):
    # x_ref: (TB, F) VMEM (streamed), w_ref: (1, F) VMEM (grid-resident),
    # b_ref: (1,) SMEM f32 scalar, o_ref: (TB, 1) VMEM.
    x = x_ref[...].astype(jnp.float32)   # upcast in-register; HBM traffic stays narrow
    w = w_ref[...].astype(jnp.float32)   # (1, F), broadcast over sublanes
    b = b_ref[0]
    # VPU broadcast-multiply + XLU last-axis reduce, f32 accumulation.
    logits = jnp.sum(x * w, axis=-1, keepdims=True) + b           # (TB, 1) f32
    o_ref[...] = jax.nn.sigmoid(logits).astype(o_ref.dtype)


# ---------------------------------------------------------------------------
# Tile-size / VMEM-budget helpers
# ---------------------------------------------------------------------------

_FAST_PATH_BYTES = 2 << 20  # below this, pallas_call launch overhead dominates


def _cdiv(a, b):
    return -(-a // b)


def _round_down(v, m):
    return (v // m) * m


def _round_up(v, m):
    return _cdiv(v, m) * m


def _sublane_multiple(itemsize):
    # f32 -> 8 rows/vreg, bf16 -> 16, int8/fp8 -> 32 (sublane packing).
    return max(8, 32 // max(1, itemsize))


def _vmem_capacity_bytes():
    try:
        return int(pltpu.get_tpu_info().vmem_capacity_bytes)
    except Exception:
        return 64 << 20  # conservative fallback (v7x per-TensorCore VMEM)


def _pick_batch_tile(batch, features, itemsize, sublane, stream_budget_bytes):
    """Largest sublane-multiple tile whose double-buffered x stream fits budget."""
    cap = max(sublane, stream_budget_bytes // (2 * features * itemsize))
    tb = min(batch, cap)
    if tb < batch:
        tb = max(sublane, _round_down(tb, sublane))
    return tb


# ---------------------------------------------------------------------------
# Forward pass: sigmoid(x @ W^T + b)
# ---------------------------------------------------------------------------

def logistic_regression(x, weight, bias, *, block_batch=None, force_pallas=False):
    """x: (B, F), weight: (1, F), bias: (1,) -> sigmoid(x @ W^T + b), shape (B, 1)."""
    B, F = x.shape
    out_dtype = x.dtype
    itemsize = jnp.dtype(x.dtype).itemsize
    x_bytes = B * F * itemsize

    # Fast path: for tiny problems XLA's fused matvec+sigmoid is strictly faster
    # than the fixed pallas_call / grid-step overhead.
    if not force_pallas and block_batch is None and x_bytes < _FAST_PATH_BYTES:
        logits = jnp.matmul(x.astype(jnp.float32), weight.astype(jnp.float32).T,
                            precision=jax.lax.Precision.HIGHEST)
        return jax.nn.sigmoid(logits + bias.astype(jnp.float32)).astype(out_dtype)

    sublane = _sublane_multiple(itemsize)
    vmem_cap = _vmem_capacity_bytes()
    # ~3/8 of physical VMEM for the double-buffered x stream:
    #   v5e/v6e (128 MiB) -> ~48 MiB ; v7x (64 MiB per TC) -> ~24 MiB.
    stream_budget = max(4 << 20, (vmem_cap * 3) // 8)

    if block_batch is not None:
        tb = min(int(block_batch), B)
        if tb < B:
            tb = max(sublane, _round_down(tb, sublane))
    else:
        tb = _pick_batch_tile(B, F, itemsize, sublane, stream_budget)
        # Keep the grid even and >= 4 so v7x's two TensorCores each get >= 2
        # pipelined steps (harmless on single-core v5e/v6e).
        steps = _cdiv(B, tb)
        if steps < 4:
            tb = min(tb, max(sublane, _round_up(_cdiv(B, 4), sublane)))
        elif steps % 2:
            tb = min(tb, max(sublane, _round_up(_cdiv(B, steps + 1), sublane)))
        tb = min(tb, B)
        if tb < B and tb % sublane:
            tb = max(sublane, _round_down(tb, sublane))

    grid = (_cdiv(B, tb),)

    # Scoped-VMEM limit: double-buffered x stream + weight/out buffers + compiler
    # scratch headroom, clamped below physical capacity (matters on v5e's 16 MiB
    # default scoped limit and v7x's 64 MiB per-TC VMEM).
    vmem_limit = 2 * tb * F * itemsize + (16 << 20)
    vmem_limit = int(max(32 << 20, min(vmem_limit, vmem_cap - (8 << 20))))

    return pl.pallas_call(
        logreg_kernel,
        out_shape=jax.ShapeDtypeStruct((B, 1), out_dtype),
        grid_spec=pltpu.PrefetchScalarGridSpec(
            num_scalar_prefetch=0,
            grid=grid,
            in_specs=[
                # x: the only streamed operand, double-buffered by Pallas.
                pl.BlockSpec((tb, F), lambda i: (i, 0)),
                # weight: constant block index -> stays resident in VMEM.
                pl.BlockSpec((1, F), lambda i: (0, 0)),
                # bias: f32 scalar in SMEM (no padded VMEM tile, no per-step DMA).
                pl.BlockSpec(memory_space=pltpu.MemorySpace.SMEM),
            ],
            out_specs=pl.BlockSpec((tb, 1), lambda i: (i, 0)),
        ),
        compiler_params=pltpu.CompilerParams(
            dimension_semantics=("parallel",),   # megacore sharding on v7x
            vmem_limit_bytes=vmem_limit,
        ),
    )(x, weight, bias.astype(jnp.float32))


def _reference(x, w, b):
    logits = jnp.matmul(x, w.T, precision=jax.lax.Precision.HIGHEST) + b
    return jax.nn.sigmoid(logits)


if __name__ == "__main__":
    key = jax.random.PRNGKey(0)
    kx, kw, kb, kx2, kx3 = jax.random.split(key, 5)

    # Small demo shapes consistent with the PyTorch module (nn.Linear(F, 1)).
    batch, n_input_features = 8, 32
    bound = 1.0 / (n_input_features ** 0.5)   # nn.Linear's uniform init bounds
    weight = jax.random.uniform(kw, (1, n_input_features),
                                minval=-bound, maxval=bound, dtype=jnp.float32)
    bias = jax.random.uniform(kb, (1,), minval=-bound, maxval=bound,
                              dtype=jnp.float32)
    x = jax.random.normal(kx, (batch, n_input_features), dtype=jnp.float32)

    # 1) tiny shape -> XLA fast path, 2) same shape forced through the Pallas kernel.
    y = logistic_regression(x, weight, bias)
    y_forced = logistic_regression(x, weight, bias, force_pallas=True)
    jax.block_until_ready((y, y_forced))
    y_ref = _reference(x, weight, bias)
    assert y.shape == (batch, 1) and y_forced.shape == (batch, 1)
    assert jnp.allclose(y, y_ref, atol=1e-5, rtol=1e-5)
    assert jnp.allclose(y_forced, y_ref, atol=1e-5, rtol=1e-5)

    # 3) multi-step pipelined grid with a partial last tile (explicit tile size).
    B2, F2 = 272, 128
    w2 = jax.random.uniform(kw, (1, F2), minval=-0.1, maxval=0.1, dtype=jnp.float32)
    b2 = jax.random.uniform(kb, (1,), minval=-0.1, maxval=0.1, dtype=jnp.float32)
    x2 = jax.random.normal(kx2, (B2, F2), dtype=jnp.float32)
    y2 = logistic_regression(x2, w2, b2, block_batch=64)   # grid of 5, partial tail
    jax.block_until_ready(y2)
    assert y2.shape == (B2, 1)
    assert jnp.allclose(y2, _reference(x2, w2, b2), atol=1e-5, rtol=1e-5)

    # 4) auto-tiled Pallas path: exercises the VMEM-budget tile picker and the
    #    even/>=4 grid adjustment for v7x megacore.
    B3, F3 = 4096, 256
    w3 = jax.random.uniform(kw, (1, F3), minval=-0.05, maxval=0.05, dtype=jnp.float32)
    b3 = jax.random.uniform(kb, (1,), minval=-0.05, maxval=0.05, dtype=jnp.float32)
    x3 = jax.random.normal(kx3, (B3, F3), dtype=jnp.float32)
    y3 = logistic_regression(x3, w3, b3)
    jax.block_until_ready(y3)
    assert y3.shape == (B3, 1)
    assert jnp.allclose(y3, _reference(x3, w3, b3), atol=1e-5, rtol=1e-5)

    print("KERNEL_OK")
</pallas_src>

<mosaic_0001>
module attributes {stable_mosaic.version = 11 : i64} {
  func.func @logreg_kernel(%arg0: i32, %arg1: memref<8x32xf32, #tpu.memory_space<vmem>>, %arg2: memref<1x32xf32, #tpu.memory_space<vmem>>, %arg3: memref<1xf32, #tpu.memory_space<smem>>, %arg4: memref<8x1xf32, #tpu.memory_space<vmem>>) attributes {dimension_semantics = [#tpu.dimension_semantics<parallel>], iteration_bounds = array<i64: 1>, scalar_prefetch = 0 : i64, scratch_operands = 0 : i64, tpu.core_type = #tpu.core_type<tc>, window_params = [{transform_indices = @transform_0, window_bounds = array<i64: 8, 32>}, {pipeline_mode = #tpu.pipeline_mode<synchronous>, transform_indices = @transform_1, window_bounds = array<i64: 1, 32>}, {transform_indices = @transform_2, window_bounds = array<i64: 1>}, {transform_indices = @transform_3, window_bounds = array<i64: 8, 1>}]} {
    %c0 = arith.constant 0 : index
    %c0_0 = arith.constant 0 : index
    %0 = vector.load %arg1[%c0, %c0_0] : memref<8x32xf32, #tpu.memory_space<vmem>>, vector<8x32xf32>
    %c0_1 = arith.constant 0 : index
    %c0_2 = arith.constant 0 : index
    %1 = vector.load %arg2[%c0_1, %c0_2] : memref<1x32xf32, #tpu.memory_space<vmem>>, vector<1x32xf32>
    %c0_3 = arith.constant 0 : index
    %2 = memref.load %arg3[%c0_3] : memref<1xf32, #tpu.memory_space<smem>>
    %3 = vector.broadcast %1 : vector<1x32xf32> to vector<8x32xf32>
    %4 = arith.mulf %0, %3 : vector<8x32xf32>
    %cst = arith.constant dense<0.000000e+00> : vector<8xf32>
    %5 = vector.multi_reduction <add>, %4, %cst [1] : vector<8x32xf32> to vector<8xf32>
    %6 = vector.shape_cast %5 : vector<8xf32> to vector<8x1xf32>
    %7 = vector.broadcast %2 : f32 to vector<8x1xf32>
    %8 = arith.addf %6, %7 : vector<8x1xf32>
    %9 = arith.negf %8 : vector<8x1xf32>
    %10 = math.exp %9 : vector<8x1xf32>
    %cst_4 = arith.constant 1.000000e+00 : f32
    %11 = vector.broadcast %cst_4 : f32 to vector<8x1xf32>
    %12 = arith.addf %11, %10 : vector<8x1xf32>
    %13 = arith.divf %11, %12 : vector<8x1xf32>
    %c0_5 = arith.constant 0 : index
    %c0_6 = arith.constant 0 : index
    %14 = vector.load %arg4[%c0_5, %c0_6] : memref<8x1xf32, #tpu.memory_space<vmem>>, vector<8x1xf32>
    tpu.vector_store %arg4[%c0_5, %c0_6], %13 {strides = array<i32>} : memref<8x1xf32, #tpu.memory_space<vmem>>, vector<8x1xf32>,
    return
  }
  func.func @transform_0(%arg0: i32) -> (i32, i32) {
    %c0_i32 = arith.constant 0 : i32
    %c0_i32_0 = arith.constant 0 : i32
    return %arg0, %c0_i32 : i32, i32
  }
  func.func @transform_1(%arg0: i32) -> (i32, i32) {
    %c0_i32 = arith.constant 0 : i32
    %c0_i32_0 = arith.constant 0 : i32
    %c0_i32_1 = arith.constant 0 : i32
    return %c0_i32, %c0_i32_0 : i32, i32
  }
  func.func @transform_2(%arg0: i32) -> i32 {
    %c0_i32 = arith.constant 0 : i32
    %c0_i32_0 = arith.constant 0 : i32
    return %c0_i32 : i32
  }
  func.func @transform_3(%arg0: i32) -> (i32, i32) {
    %c0_i32 = arith.constant 0 : i32
    %c0_i32_0 = arith.constant 0 : i32
    return %arg0, %c0_i32 : i32, i32
  }
}

</mosaic_0001>

<bundles_post_ra>
// kernel: tpu_custom_call.1
= control target key start
LH: loop header
LB: loop body
LE: loop exit
PB: predicated region body
PF: predicated region fallthrough
CT: control target
= control target key end

     0   :  { %9 = vsyncpa [#allocation4], 0  ;;  %s87_s12 = smov [#allocation3]   ;;  %s129_s0 = inlined_call_operand.hbm [shape: f32[8,32], index: 0, kind: input, shape index: {}]   ;;  %s130_s1 = inlined_call_operand.vmem [shape: f32[1,32], index: 1, kind: input, shape index: {}]   ;;  %s131_s2 = inlined_call_operand.<no memory space> [shape: f32[1], index: 2, kind: input, shape index: {}]   ;;  %s132_s3 = inlined_call_operand.vmem [shape: f32[8,1], index: 3, kind: output, shape index: {}]  }
   0x1   :  { %s16_s13 = sshll.u32 %s87_s12, 4  ;;  %s63_s16 = scalar_lea.hbm %s129_s0, 128  ;;  %s17_s13 = int_to_ptr.vmem [resolvable:$true] %s16_s13 }
   0x2   :  { %p64_p0 = scmp.ne.s32.totalorder %s129_s0, %s63_s16  ;;  %p67_p1 = scmp.lt.u32.totalorder %s63_s16, %s129_s0 }
   0x4   :  { %p69_p2 = pnand %p67_p1, %p64_p0 }
   0x6   :  { %72 = shalt.err (!%p69_p2)
}
   0x7   :  { %s73_s21 = scalar_lea.vmem %s17_s13, 128  ;;  %p78_p4 = scmp.lt.s32.totalorder %s17_s13, %s17_s13 }
   0x8   :  { %p74_p3 = scmp.ne.s32.totalorder %s17_s13, %s73_s21  ;;  %p79_p5 = scmp.lt.s32.totalorder %s73_s21, %s73_s21 }
   0xa   :  { %p80_p6 = por %p79_p5, %p78_p4 }
   0xc   :  { %p81_p7 = pnand %p80_p6, %p74_p3 }
   0xe   :  { %84 = shalt.err (!%p81_p7)
}
   0xf   :  { %19 = dma.hbm_to_vmem [thread:$0]  %s129_s0, 128, %s17_s13, [#allocation4]  }
  0x10   :  { %85 = dma.done.wait [#allocation4], 128  }
  0x11   :  { %86 = vsyncadd [#allocation4], 4294967168  ;;  %v27_v0 = vld [vmem:[#allocation3] sm:$0xff]  ;;  %vm37_vm0 = vcmask 261120   ;;  %v41_v4 = vstv %s131_s2  ;;  %vm49_vm1 = vcmask 7168  }
  0x12   :  { %v56_v1 = vld [vmem:[%s130_s1] ss:$0 sm:$0xff] }
  0x13   :  { %v36_v2 = vmul.f32 %v56_v1, %v27_v0 }
  0x15   :  { %v38_v3 = vsel %vm37_vm0, %v36_v2, 0.0 }
  0x16   :  { %39 = vadd.xlane.f32.xlu0 %v38_v3 }
  0xa3   :  { %v40_v5 = vpop.xlane.xlu0 %39 }
  0xa4   :  { %v42_v6 = vadd.f32 %v41_v4, %v40_v5 }
  0xa6   :  { %v57_v7 = vmul.f32 -1.442695, %v42_v6 }
  0xa8   :  { %59 = vpow2.f32 %v57_v7 }
  0xb2   :  { %v60_v8 = vpop.eup %59 }
  0xb3   :  { %v46_v9 = vadd.f32 1.0, %v60_v8 }
  0xb5   :  { %61 = vrcp.f32 %v46_v9 }
  0xbf   :  { %v62_v10 = vpop.eup %61 }
  0xc0   :  { %50 = vst.msk [vmem:[%s132_s3] sm:$0xff] %vm49_vm1, %v62_v10 }
  0xc1   :  { %55 = vsyncpa [#allocation4], 1 }

</bundles_post_ra>
